<compile_context>
chip_gen: v7x
topology: tpu7x:2x2x1
jax: 0.10.0
libtpu: 0.0.40
codegen_flags: <defaults>
</compile_context>

<pallas_src>
import jax
import jax.numpy as jnp
from jax.experimental import pallas as pl
from jax.experimental.pallas import tpu as pltpu

HIDDEN = 14
LANE = 128
MAX_BLOCK_ROWS = 1024  # 1024*128*4B = 512 KiB per block buffer


def _mlp_kernel(w1_ref, b1_ref, w2_ref, b2_ref, x_ref, o_ref):
    """Elementwise MLP: o = b2 + sum_j w2[j] * tanh(w1[j]*x + b1[j]).

    x_ref / o_ref : (block_rows, 128) f32 in VMEM, batch lane-dense.
    w1/b1/w2      : (14,) f32 in SMEM;  b2 : (1,) f32 in SMEM.
    """
    x = x_ref[...]
    # Two independent accumulators -> shorter serial dependence through the
    # adds, better interleave of EUP pushes/pops.  Combined at the end.
    acc0 = jnp.full_like(x, b2_ref[0])
    acc1 = jnp.zeros_like(x)
    # Static unroll over the 14 hidden units: scalar-splat mul/add (VPU) +
    # tanh (EUP, its own bundle slot).  No MXU involvement.
    for j in range(HIDDEN):
        term = w2_ref[j] * jnp.tanh(x * w1_ref[j] + b1_ref[j])
        if j % 2 == 0:
            acc0 = acc0 + term
        else:
            acc1 = acc1 + term
    o_ref[...] = (acc0 + acc1).astype(o_ref.dtype)


def subclass_functional_model(x, w1, b1, w2, b2):
    """Pallas TPU implementation of SubclassFunctionalModel.forward.

    x : (B, 1) float32
    w1: (14, 1), b1: (14,), w2: (1, 14), b2: (1,)  -- PyTorch Linear shapes
    returns: (B, 1) float32
    """
    B = x.shape[0]
    out_dtype = x.dtype

    # Flatten the 43 parameter floats for SMEM residence (w1 (14,1) and
    # w2 (1,14) both flatten to (14,); no transposes needed in-kernel).
    w1f = w1.reshape(-1).astype(jnp.float32)   # (14,)
    b1f = b1.reshape(-1).astype(jnp.float32)   # (14,)
    w2f = w2.reshape(-1).astype(jnp.float32)   # (14,)
    b2f = b2.reshape(-1).astype(jnp.float32)   # (1,)

    # Lane-dense layout: pad batch and view as (total_rows, 128).
    rows_needed = pl.cdiv(B, LANE)                       # >= 1
    block_rows = min(max(rows_needed, 8), MAX_BLOCK_ROWS)
    block_rows = ((block_rows + 7) // 8) * 8             # sublane multiple of 8
    total_rows = pl.cdiv(rows_needed, block_rows) * block_rows
    padded = total_rows * LANE

    xf = x.reshape(-1).astype(jnp.float32)
    if padded != B:
        xf = jnp.pad(xf, (0, padded - B))                # zero pad (tanh-safe)
    x2d = xf.reshape(total_rows, LANE)

    grid = (total_rows // block_rows,)
    smem_spec = pl.BlockSpec(memory_space=pltpu.MemorySpace.SMEM)

    out2d = pl.pallas_call(
        _mlp_kernel,
        out_shape=jax.ShapeDtypeStruct((total_rows, LANE), jnp.float32),
        grid=grid,
        in_specs=[
            smem_spec,  # w1 (14,)
            smem_spec,  # b1 (14,)
            smem_spec,  # w2 (14,)
            smem_spec,  # b2 (1,)
            pl.BlockSpec((block_rows, LANE), lambda i: (i, 0)),  # x tiles
        ],
        out_specs=pl.BlockSpec((block_rows, LANE), lambda i: (i, 0)),
        compiler_params=pltpu.CompilerParams(
            dimension_semantics=("parallel",)),
    )(w1f, b1f, w2f, b2f, x2d)

    # Back to the PyTorch (B, 1) layout; drop padding.
    return out2d.reshape(-1)[:B].reshape(B, 1).astype(out_dtype)


def _reference(x, w1, b1, w2, b2):
    return jnp.tanh(x @ w1.T + b1) @ w2.T + b2


if __name__ == "__main__":
    key = jax.random.PRNGKey(0)
    k_x, k_w1, k_b1, k_w2, k_b2 = jax.random.split(key, 5)

    # PyTorch Linear param shapes:
    #   hidden_linear: Linear(1, 14) -> W1 (14, 1), b1 (14,)
    #   output_linear: Linear(14, 1) -> W2 (1, 14), b2 (1,)
    w1 = jax.random.normal(k_w1, (14, 1), dtype=jnp.float32) * 0.5
    b1 = jax.random.normal(k_b1, (14,), dtype=jnp.float32) * 0.1
    w2 = jax.random.normal(k_w2, (1, 14), dtype=jnp.float32) * 0.5
    b2 = jax.random.normal(k_b2, (1,), dtype=jnp.float32) * 0.1

    # Small-batch case (single (8,128) block, grid=(1,)).
    B = 8
    x = jax.random.normal(k_x, (B, 1), dtype=jnp.float32)
    out = subclass_functional_model(x, w1, b1, w2, b2)
    jax.block_until_ready(out)
    ref = _reference(x, w1, b1, w2, b2)
    assert out.shape == (B, 1), out.shape
    assert jnp.allclose(out, ref, atol=1e-5, rtol=1e-5), "mismatch vs reference (B=8)"

    # Larger batch exercising padding + lane-dense tiling.
    B2 = 70000
    x2 = jax.random.normal(k_x, (B2, 1), dtype=jnp.float32)
    out2 = subclass_functional_model(x2, w1, b1, w2, b2)
    jax.block_until_ready(out2)
    ref2 = _reference(x2, w1, b1, w2, b2)
    assert out2.shape == (B2, 1), out2.shape
    assert jnp.allclose(out2, ref2, atol=1e-5, rtol=1e-5), "mismatch vs reference (B=70000)"

    print("KERNEL_OK")
</pallas_src>

<mosaic_0001>
module attributes {stable_mosaic.version = 11 : i64} {
  func.func @_mlp_kernel(%arg0: i32, %arg1: memref<14xf32, #tpu.memory_space<smem>>, %arg2: memref<14xf32, #tpu.memory_space<smem>>, %arg3: memref<14xf32, #tpu.memory_space<smem>>, %arg4: memref<1xf32, #tpu.memory_space<smem>>, %arg5: memref<8x128xf32, #tpu.memory_space<vmem>>, %arg6: memref<8x128xf32, #tpu.memory_space<vmem>>) attributes {dimension_semantics = [#tpu.dimension_semantics<parallel>], iteration_bounds = array<i64: 1>, scalar_prefetch = 0 : i64, scratch_operands = 0 : i64, tpu.core_type = #tpu.core_type<tc>, window_params = [{transform_indices = @transform_0, window_bounds = array<i64: 14>}, {transform_indices = @transform_1, window_bounds = array<i64: 14>}, {transform_indices = @transform_2, window_bounds = array<i64: 14>}, {transform_indices = @transform_3, window_bounds = array<i64: 1>}, {transform_indices = @transform_4, window_bounds = array<i64: 8, 128>}, {transform_indices = @transform_5, window_bounds = array<i64: 8, 128>}]} {
    %c0 = arith.constant 0 : index
    %c0_0 = arith.constant 0 : index
    %0 = vector.load %arg5[%c0, %c0_0] : memref<8x128xf32, #tpu.memory_space<vmem>>, vector<8x128xf32>
    %c0_1 = arith.constant 0 : index
    %1 = memref.load %arg4[%c0_1] : memref<1xf32, #tpu.memory_space<smem>>
    %2 = vector.broadcast %1 : f32 to vector<8x128xf32>
    %cst = arith.constant 0.000000e+00 : f32
    %3 = vector.broadcast %cst : f32 to vector<8x128xf32>
    %c0_2 = arith.constant 0 : index
    %4 = memref.load %arg3[%c0_2] : memref<14xf32, #tpu.memory_space<smem>>
    %c0_3 = arith.constant 0 : index
    %5 = memref.load %arg1[%c0_3] : memref<14xf32, #tpu.memory_space<smem>>
    %6 = vector.broadcast %5 : f32 to vector<8x128xf32>
    %7 = arith.mulf %0, %6 : vector<8x128xf32>
    %c0_4 = arith.constant 0 : index
    %8 = memref.load %arg2[%c0_4] : memref<14xf32, #tpu.memory_space<smem>>
    %9 = vector.broadcast %8 : f32 to vector<8x128xf32>
    %10 = arith.addf %7, %9 : vector<8x128xf32>
    %11 = math.tanh %10 : vector<8x128xf32>
    %12 = vector.broadcast %4 : f32 to vector<8x128xf32>
    %13 = arith.mulf %12, %11 : vector<8x128xf32>
    %14 = arith.addf %2, %13 : vector<8x128xf32>
    %c1 = arith.constant 1 : index
    %15 = memref.load %arg3[%c1] : memref<14xf32, #tpu.memory_space<smem>>
    %c1_5 = arith.constant 1 : index
    %16 = memref.load %arg1[%c1_5] : memref<14xf32, #tpu.memory_space<smem>>
    %17 = vector.broadcast %16 : f32 to vector<8x128xf32>
    %18 = arith.mulf %0, %17 : vector<8x128xf32>
    %c1_6 = arith.constant 1 : index
    %19 = memref.load %arg2[%c1_6] : memref<14xf32, #tpu.memory_space<smem>>
    %20 = vector.broadcast %19 : f32 to vector<8x128xf32>
    %21 = arith.addf %18, %20 : vector<8x128xf32>
    %22 = math.tanh %21 : vector<8x128xf32>
    %23 = vector.broadcast %15 : f32 to vector<8x128xf32>
    %24 = arith.mulf %23, %22 : vector<8x128xf32>
    %25 = arith.addf %3, %24 : vector<8x128xf32>
    %c2 = arith.constant 2 : index
    %26 = memref.load %arg3[%c2] : memref<14xf32, #tpu.memory_space<smem>>
    %c2_7 = arith.constant 2 : index
    %27 = memref.load %arg1[%c2_7] : memref<14xf32, #tpu.memory_space<smem>>
    %28 = vector.broadcast %27 : f32 to vector<8x128xf32>
    %29 = arith.mulf %0, %28 : vector<8x128xf32>
    %c2_8 = arith.constant 2 : index
    %30 = memref.load %arg2[%c2_8] : memref<14xf32, #tpu.memory_space<smem>>
    %31 = vector.broadcast %30 : f32 to vector<8x128xf32>
    %32 = arith.addf %29, %31 : vector<8x128xf32>
    %33 = math.tanh %32 : vector<8x128xf32>
    %34 = vector.broadcast %26 : f32 to vector<8x128xf32>
    %35 = arith.mulf %34, %33 : vector<8x128xf32>
    %36 = arith.addf %14, %35 : vector<8x128xf32>
    %c3 = arith.constant 3 : index
    %37 = memref.load %arg3[%c3] : memref<14xf32, #tpu.memory_space<smem>>
    %c3_9 = arith.constant 3 : index
    %38 = memref.load %arg1[%c3_9] : memref<14xf32, #tpu.memory_space<smem>>
    %39 = vector.broadcast %38 : f32 to vector<8x128xf32>
    %40 = arith.mulf %0, %39 : vector<8x128xf32>
    %c3_10 = arith.constant 3 : index
    %41 = memref.load %arg2[%c3_10] : memref<14xf32, #tpu.memory_space<smem>>
    %42 = vector.broadcast %41 : f32 to vector<8x128xf32>
    %43 = arith.addf %40, %42 : vector<8x128xf32>
    %44 = math.tanh %43 : vector<8x128xf32>
    %45 = vector.broadcast %37 : f32 to vector<8x128xf32>
    %46 = arith.mulf %45, %44 : vector<8x128xf32>
    %47 = arith.addf %25, %46 : vector<8x128xf32>
    %c4 = arith.constant 4 : index
    %48 = memref.load %arg3[%c4] : memref<14xf32, #tpu.memory_space<smem>>
    %c4_11 = arith.constant 4 : index
    %49 = memref.load %arg1[%c4_11] : memref<14xf32, #tpu.memory_space<smem>>
    %50 = vector.broadcast %49 : f32 to vector<8x128xf32>
    %51 = arith.mulf %0, %50 : vector<8x128xf32>
    %c4_12 = arith.constant 4 : index
    %52 = memref.load %arg2[%c4_12] : memref<14xf32, #tpu.memory_space<smem>>
    %53 = vector.broadcast %52 : f32 to vector<8x128xf32>
    %54 = arith.addf %51, %53 : vector<8x128xf32>
    %55 = math.tanh %54 : vector<8x128xf32>
    %56 = vector.broadcast %48 : f32 to vector<8x128xf32>
    %57 = arith.mulf %56, %55 : vector<8x128xf32>
    %58 = arith.addf %36, %57 : vector<8x128xf32>
    %c5 = arith.constant 5 : index
    %59 = memref.load %arg3[%c5] : memref<14xf32, #tpu.memory_space<smem>>
    %c5_13 = arith.constant 5 : index
    %60 = memref.load %arg1[%c5_13] : memref<14xf32, #tpu.memory_space<smem>>
    %61 = vector.broadcast %60 : f32 to vector<8x128xf32>
    %62 = arith.mulf %0, %61 : vector<8x128xf32>
    %c5_14 = arith.constant 5 : index
    %63 = memref.load %arg2[%c5_14] : memref<14xf32, #tpu.memory_space<smem>>
    %64 = vector.broadcast %63 : f32 to vector<8x128xf32>
    %65 = arith.addf %62, %64 : vector<8x128xf32>
    %66 = math.tanh %65 : vector<8x128xf32>
    %67 = vector.broadcast %59 : f32 to vector<8x128xf32>
    %68 = arith.mulf %67, %66 : vector<8x128xf32>
    %69 = arith.addf %47, %68 : vector<8x128xf32>
    %c6 = arith.constant 6 : index
    %70 = memref.load %arg3[%c6] : memref<14xf32, #tpu.memory_space<smem>>
    %c6_15 = arith.constant 6 : index
    %71 = memref.load %arg1[%c6_15] : memref<14xf32, #tpu.memory_space<smem>>
    %72 = vector.broadcast %71 : f32 to vector<8x128xf32>
    %73 = arith.mulf %0, %72 : vector<8x128xf32>
    %c6_16 = arith.constant 6 : index
    %74 = memref.load %arg2[%c6_16] : memref<14xf32, #tpu.memory_space<smem>>
    %75 = vector.broadcast %74 : f32 to vector<8x128xf32>
    %76 = arith.addf %73, %75 : vector<8x128xf32>
    %77 = math.tanh %76 : vector<8x128xf32>
    %78 = vector.broadcast %70 : f32 to vector<8x128xf32>
    %79 = arith.mulf %78, %77 : vector<8x128xf32>
    %80 = arith.addf %58, %79 : vector<8x128xf32>
    %c7 = arith.constant 7 : index
    %81 = memref.load %arg3[%c7] : memref<14xf32, #tpu.memory_space<smem>>
    %c7_17 = arith.constant 7 : index
    %82 = memref.load %arg1[%c7_17] : memref<14xf32, #tpu.memory_space<smem>>
    %83 = vector.broadcast %82 : f32 to vector<8x128xf32>
    %84 = arith.mulf %0, %83 : vector<8x128xf32>
    %c7_18 = arith.constant 7 : index
    %85 = memref.load %arg2[%c7_18] : memref<14xf32, #tpu.memory_space<smem>>
    %86 = vector.broadcast %85 : f32 to vector<8x128xf32>
    %87 = arith.addf %84, %86 : vector<8x128xf32>
    %88 = math.tanh %87 : vector<8x128xf32>
    %89 = vector.broadcast %81 : f32 to vector<8x128xf32>
    %90 = arith.mulf %89, %88 : vector<8x128xf32>
    %91 = arith.addf %69, %90 : vector<8x128xf32>
    %c8 = arith.constant 8 : index
    %92 = memref.load %arg3[%c8] : memref<14xf32, #tpu.memory_space<smem>>
    %c8_19 = arith.constant 8 : index
    %93 = memref.load %arg1[%c8_19] : memref<14xf32, #tpu.memory_space<smem>>
    %94 = vector.broadcast %93 : f32 to vector<8x128xf32>
    %95 = arith.mulf %0, %94 : vector<8x128xf32>
    %c8_20 = arith.constant 8 : index
    %96 = memref.load %arg2[%c8_20] : memref<14xf32, #tpu.memory_space<smem>>
    %97 = vector.broadcast %96 : f32 to vector<8x128xf32>
    %98 = arith.addf %95, %97 : vector<8x128xf32>
    %99 = math.tanh %98 : vector<8x128xf32>
    %100 = vector.broadcast %92 : f32 to vector<8x128xf32>
    %101 = arith.mulf %100, %99 : vector<8x128xf32>
    %102 = arith.addf %80, %101 : vector<8x128xf32>
    %c9 = arith.constant 9 : index
    %103 = memref.load %arg3[%c9] : memref<14xf32, #tpu.memory_space<smem>>
    %c9_21 = arith.constant 9 : index
    %104 = memref.load %arg1[%c9_21] : memref<14xf32, #tpu.memory_space<smem>>
    %105 = vector.broadcast %104 : f32 to vector<8x128xf32>
    %106 = arith.mulf %0, %105 : vector<8x128xf32>
    %c9_22 = arith.constant 9 : index
    %107 = memref.load %arg2[%c9_22] : memref<14xf32, #tpu.memory_space<smem>>
    %108 = vector.broadcast %107 : f32 to vector<8x128xf32>
    %109 = arith.addf %106, %108 : vector<8x128xf32>
    %110 = math.tanh %109 : vector<8x128xf32>
    %111 = vector.broadcast %103 : f32 to vector<8x128xf32>
    %112 = arith.mulf %111, %110 : vector<8x128xf32>
    %113 = arith.addf %91, %112 : vector<8x128xf32>
    %c10 = arith.constant 10 : index
    %114 = memref.load %arg3[%c10] : memref<14xf32, #tpu.memory_space<smem>>
    %c10_23 = arith.constant 10 : index
    %115 = memref.load %arg1[%c10_23] : memref<14xf32, #tpu.memory_space<smem>>
    %116 = vector.broadcast %115 : f32 to vector<8x128xf32>
    %117 = arith.mulf %0, %116 : vector<8x128xf32>
    %c10_24 = arith.constant 10 : index
    %118 = memref.load %arg2[%c10_24] : memref<14xf32, #tpu.memory_space<smem>>
    %119 = vector.broadcast %118 : f32 to vector<8x128xf32>
    %120 = arith.addf %117, %119 : vector<8x128xf32>
    %121 = math.tanh %120 : vector<8x128xf32>
    %122 = vector.broadcast %114 : f32 to vector<8x128xf32>
    %123 = arith.mulf %122, %121 : vector<8x128xf32>
    %124 = arith.addf %102, %123 : vector<8x128xf32>
    %c11 = arith.constant 11 : index
    %125 = memref.load %arg3[%c11] : memref<14xf32, #tpu.memory_space<smem>>
    %c11_25 = arith.constant 11 : index
    %126 = memref.load %arg1[%c11_25] : memref<14xf32, #tpu.memory_space<smem>>
    %127 = vector.broadcast %126 : f32 to vector<8x128xf32>
    %128 = arith.mulf %0, %127 : vector<8x128xf32>
    %c11_26 = arith.constant 11 : index
    %129 = memref.load %arg2[%c11_26] : memref<14xf32, #tpu.memory_space<smem>>
    %130 = vector.broadcast %129 : f32 to vector<8x128xf32>
    %131 = arith.addf %128, %130 : vector<8x128xf32>
    %132 = math.tanh %131 : vector<8x128xf32>
    %133 = vector.broadcast %125 : f32 to vector<8x128xf32>
    %134 = arith.mulf %133, %132 : vector<8x128xf32>
    %135 = arith.addf %113, %134 : vector<8x128xf32>
    %c12 = arith.constant 12 : index
    %136 = memref.load %arg3[%c12] : memref<14xf32, #tpu.memory_space<smem>>
    %c12_27 = arith.constant 12 : index
    %137 = memref.load %arg1[%c12_27] : memref<14xf32, #tpu.memory_space<smem>>
    %138 = vector.broadcast %137 : f32 to vector<8x128xf32>
    %139 = arith.mulf %0, %138 : vector<8x128xf32>
    %c12_28 = arith.constant 12 : index
    %140 = memref.load %arg2[%c12_28] : memref<14xf32, #tpu.memory_space<smem>>
    %141 = vector.broadcast %140 : f32 to vector<8x128xf32>
    %142 = arith.addf %139, %141 : vector<8x128xf32>
    %143 = math.tanh %142 : vector<8x128xf32>
    %144 = vector.broadcast %136 : f32 to vector<8x128xf32>
    %145 = arith.mulf %144, %143 : vector<8x128xf32>
    %146 = arith.addf %124, %145 : vector<8x128xf32>
    %c13 = arith.constant 13 : index
    %147 = memref.load %arg3[%c13] : memref<14xf32, #tpu.memory_space<smem>>
    %c13_29 = arith.constant 13 : index
    %148 = memref.load %arg1[%c13_29] : memref<14xf32, #tpu.memory_space<smem>>
    %149 = vector.broadcast %148 : f32 to vector<8x128xf32>
    %150 = arith.mulf %0, %149 : vector<8x128xf32>
    %c13_30 = arith.constant 13 : index
    %151 = memref.load %arg2[%c13_30] : memref<14xf32, #tpu.memory_space<smem>>
    %152 = vector.broadcast %151 : f32 to vector<8x128xf32>
    %153 = arith.addf %150, %152 : vector<8x128xf32>
    %154 = math.tanh %153 : vector<8x128xf32>
    %155 = vector.broadcast %147 : f32 to vector<8x128xf32>
    %156 = arith.mulf %155, %154 : vector<8x128xf32>
    %157 = arith.addf %135, %156 : vector<8x128xf32>
    %158 = arith.addf %146, %157 : vector<8x128xf32>
    %c0_31 = arith.constant 0 : index
    %c0_32 = arith.constant 0 : index
    %159 = vector.load %arg6[%c0_31, %c0_32] : memref<8x128xf32, #tpu.memory_space<vmem>>, vector<8x128xf32>
    tpu.vector_store %arg6[%c0_31, %c0_32], %158 {strides = array<i32>} : memref<8x128xf32, #tpu.memory_space<vmem>>, vector<8x128xf32>,
    return
  }
  func.func @transform_0(%arg0: i32) -> i32 {
    %c0_i32 = arith.constant 0 : i32
    %c0_i32_0 = arith.constant 0 : i32
    return %c0_i32 : i32
  }
  func.func @transform_1(%arg0: i32) -> i32 {
    %c0_i32 = arith.constant 0 : i32
    %c0_i32_0 = arith.constant 0 : i32
    return %c0_i32 : i32
  }
  func.func @transform_2(%arg0: i32) -> i32 {
    %c0_i32 = arith.constant 0 : i32
    %c0_i32_0 = arith.constant 0 : i32
    return %c0_i32 : i32
  }
  func.func @transform_3(%arg0: i32) -> i32 {
    %c0_i32 = arith.constant 0 : i32
    %c0_i32_0 = arith.constant 0 : i32
    return %c0_i32 : i32
  }
  func.func @transform_4(%arg0: i32) -> (i32, i32) {
    %c0_i32 = arith.constant 0 : i32
    %c0_i32_0 = arith.constant 0 : i32
    return %arg0, %c0_i32 : i32, i32
  }
  func.func @transform_5(%arg0: i32) -> (i32, i32) {
    %c0_i32 = arith.constant 0 : i32
    %c0_i32_0 = arith.constant 0 : i32
    return %arg0, %c0_i32 : i32, i32
  }
}

</mosaic_0001>

<bundles_post_ra>
// kernel: tpu_custom_call.1
= control target key start
LH: loop header
LB: loop body
LE: loop exit
PB: predicated region body
PF: predicated region fallthrough
CT: control target
= control target key end

     0   :  { %11 = vsyncpa [#allocation5], 0  ;;  %s548_s0 = inlined_call_operand.vmem [shape: f32[14], index: 0, kind: input, shape index: {}]   ;;  %s549_s1 = inlined_call_operand.vmem [shape: f32[14], index: 1, kind: input, shape index: {}]   ;;  %s550_s2 = inlined_call_operand.vmem [shape: f32[14], index: 2, kind: input, shape index: {}]   ;;  %s551_s3 = inlined_call_operand.<no memory space> [shape: f32[1], index: 3, kind: input, shape index: {}]   ;;  %s552_s4 = inlined_call_operand.vmem [shape: f32[8,128], index: 4, kind: input, shape index: {}]   ;;  %s553_s5 = inlined_call_operand.hbm [shape: f32[8,128], index: 5, kind: output, shape index: {}]  }
   0x1   :  { %12 = vsyncpa [#allocation7], 0  ;;  %s30_s20 = sshll.u32 %s549_s1, 4  ;;  %s31_s20 = int_to_ptr.vmem [resolvable:$true] %s30_s20 }
   0x2   :  { %13 = vsyncpa [#allocation4], 0  ;;  %s20_s23 = sshll.u32 %s548_s0, 4  ;;  %s304_s24 = scalar_lea.vmem %s31_s20, 16  ;;  %s21_s23 = int_to_ptr.vmem [resolvable:$true] %s20_s23 }
   0x3   :  { %p305_p0 = scmp.ne.s32.totalorder %s31_s20, %s304_s24  ;;  %p309_p1 = scmp.lt.s32.totalorder %s31_s20, %s31_s20 }
   0x4   :  { %p310_p2 = scmp.lt.s32.totalorder %s304_s24, %s304_s24 }
   0x6   :  { %p311_p3 = por %p310_p2, %p309_p1 }
   0x8   :  { %p312_p4 = pnand %p311_p3, %p305_p0 }
   0xa   :  { %315 = shalt.err (!%p312_p4)
}
   0xb   :  { %s368_s25 = smov [#allocation6]   ;;  %s316_s26 = scalar_lea.vmem %s21_s23, 16 }
   0xc   :  { %33 = dma.vmem_to_smem %s31_s20, 16, %s368_s25, [#allocation7]  }
   0xd   :  { %p317_p5 = scmp.ne.s32.totalorder %s21_s23, %s316_s26  ;;  %p321_p6 = scmp.lt.s32.totalorder %s21_s23, %s21_s23 }
   0xe   :  { %p322_p7 = scmp.lt.s32.totalorder %s316_s26, %s316_s26 }
  0x10   :  { %p323_p8 = por %p322_p7, %p321_p6 }
  0x12   :  { %p324_p9 = pnand %p323_p8, %p317_p5 }
  0x14   :  { %327 = shalt.err (!%p324_p9)
}
  0x15   :  { %s369_s1 = smov [#allocation3]   ;;  %s40_s28 = sshll.u32 %s550_s2, 4  ;;  %s41_s28 = int_to_ptr.vmem [resolvable:$true] %s40_s28 }
  0x16   :  { %23 = dma.vmem_to_smem %s21_s23, 16, %s369_s1, [#allocation5]  }
  0x17   :  { %s328_s29 = scalar_lea.vmem %s41_s28, 16  ;;  %p333_p11 = scmp.lt.s32.totalorder %s41_s28, %s41_s28 }
  0x18   :  { %p329_p10 = scmp.ne.s32.totalorder %s41_s28, %s328_s29  ;;  %p334_p12 = scmp.lt.s32.totalorder %s328_s29, %s328_s29 }
  0x1a   :  { %p335_p13 = por %p334_p12, %p333_p11 }
  0x1c   :  { %p336_p0 = pnand %p335_p13, %p329_p10 }
  0x1e   :  { %339 = shalt.err (!%p336_p0)
}
  0x1f   :  { %s370_s30 = smov [#allocation8]  }
  0x20   :  { %43 = dma.vmem_to_smem %s41_s28, 16, %s370_s30, [#allocation7]  }
  0x21   :  { %362 = dma.done.wait [#allocation5], 16  }
  0x22   :  { %363 = vsyncadd [#allocation5], 4294967280 }
  0x23   :  { %364 = dma.done.wait [#allocation7], 32  }
  0x24   :  { %365 = vsyncadd [#allocation7], 4294967264 }
  0x25   :  { %57 = sfence }
  0x26   :  { %s62_s6 = sld [smem:[#allocation3]]  ;;  %s234_s8 = sld [smem:[#allocation3 + $0x1]]  ;;  %v414_v0 = vld [vmem:[%s552_s4] sm:$0xff]  ;;  %v60_v17 = vstv %s551_s3 }
  0x27   :  { %s65_s7 = sld [smem:[#allocation6]]  ;;  %s235_s9 = sld [smem:[#allocation6 + $0x1]] }
  0x28   :  { %s237_s2 = sld [smem:[#allocation3 + $0x2]]  ;;  %s240_s13 = sld [smem:[#allocation3 + $0x3]] }
  0x29   :  { %s238_s12 = sld [smem:[#allocation6 + $0x2]]  ;;  %s416_s14 = sld [smem:[#allocation6 + $0x3]] }
  0x2a   :  { %s418_s15 = sld [smem:[#allocation8]]  ;;  %s420_s16 = sld [smem:[#allocation3 + $0x4]] }
  0x2b   :  { %s423_s17 = sld [smem:[#allocation8 + $0x1]]  ;;  %s425_s18 = sld [smem:[#allocation6 + $0x4]] }
  0x2c   :  { %v63_v1 = vstv %s62_s6  ;;  %v74_v4 = vstv %s234_s8  ;;  %s427_s4 = sld [smem:[#allocation3 + $0x5]]  ;;  %s432_s20 = sld [smem:[#allocation8 + $0x2]] }
  0x2d   :  { %v64_v2 = vmul.f32 %v63_v1, %v414_v0  ;;  %v66_v3 = vstv %s65_s7  ;;  %v77_v5 = vstv %s235_s9  ;;  %s429_s19 = sld [smem:[#allocation6 + $0x5]]  ;;  %v75_v7 = vmul.f32 %v74_v4, %v414_v0  ;;  %s434_s21 = sld [smem:[#allocation3 + $0x6]] }
  0x2e   :  { %v85_v8 = vstv %s237_s2  ;;  %s437_s22 = sld [smem:[#allocation8 + $0x3]]  ;;  %s439_s23 = sld [smem:[#allocation6 + $0x6]]  ;;  %v96_v12 = vstv %s240_s13 }
  0x2f   :  { %v67_v6 = vadd.f32 %v66_v3, %v64_v2  ;;  %v86_v9 = vmul.f32 %v85_v8, %v414_v0  ;;  %v88_v10 = vstv %s238_s12  ;;  %v78_v11 = vadd.f32 %v77_v5, %v75_v7  ;;  %s442_s24 = sld [smem:[#allocation3 + $0x7]]  ;;  %s448_s26 = sld [smem:[#allocation3 + $0x8]] }
  0x30   :  { %v99_v13 = vstv %s416_s14  ;;  %s444_s25 = sld [smem:[#allocation6 + $0x7]]  ;;  %v97_v15 = vmul.f32 %v96_v12, %v414_v0  ;;  %v107_v16 = vstv %s420_s16  ;;  %s453_s27 = sld [smem:[#allocation8 + $0x4]]  ;;  %v69_v23 = vstv %s418_s15 }
  0x31   :  { %276 = vtanh.f32 %v67_v6  ;;  %v89_v14 = vadd.f32 %v88_v10, %v86_v9  ;;  %v108_v18 = vmul.f32 %v107_v16, %v414_v0  ;;  %v110_v19 = vstv %s425_s18  ;;  %s457_s28 = sld [smem:[#allocation6 + $0x8]]  ;;  %s461_s29 = sld [smem:[#allocation3 + $0x9]] }
  0x32   :  { %278 = vtanh.f32 %v78_v11  ;;  %v100_v20 = vadd.f32 %v99_v13, %v97_v15  ;;  %v118_v21 = vstv %s427_s4  ;;  %s463_s30 = sld [smem:[#allocation6 + $0x9]]  ;;  %s468_s6 = sld [smem:[#allocation3 + $0xa]]  ;;  %v80_v27 = vstv %s423_s17 }
  0x33   :  { %280 = vtanh.f32 %v89_v14  ;;  %v121_v22 = vstv %s429_s19  ;;  %v111_v24 = vadd.f32 %v110_v19, %v108_v18  ;;  %v119_v25 = vmul.f32 %v118_v21, %v414_v0  ;;  %s471_s7 = sld [smem:[#allocation8 + $0x5]]  ;;  %s475_s8 = sld [smem:[#allocation6 + $0xa]] }
  0x34   :  { %v129_v26 = vstv %s434_s21  ;;  %282 = vtanh.f32 %v100_v20  ;;  %v132_v29 = vstv %s439_s23  ;;  %s479_s9 = sld [smem:[#allocation3 + $0xb]]  ;;  %v91_v33 = vstv %s432_s20  ;;  %s486_s10 = sld [smem:[#allocation3 + $0xc]] }
  0x35   :  { %v130_v28 = vmul.f32 %v129_v26, %v414_v0  ;;  %284 = vtanh.f32 %v111_v24  ;;  %v122_v30 = vadd.f32 %v121_v22, %v119_v25  ;;  %v140_v31 = vstv %s442_s24  ;;  %s481_s2 = sld [smem:[#allocation6 + $0xb]]  ;;  %s489_s11 = sld [smem:[#allocation8 + $0x6]] }
  0x36   :  { %v143_v32 = vstv %s444_s25  ;;  %v141_v35 = vmul.f32 %v140_v31, %v414_v0  ;;  %v151_v36 = vstv %s448_s26  ;;  %v102_v37 = vstv %s437_s22  ;;  %s493_s12 = sld [smem:[#allocation6 + $0xc]]  ;;  %s497_s13 = sld [smem:[#allocation3 + $0xd]] }
  0x37   :  { %v133_v34 = vadd.f32 %v132_v29, %v130_v28  ;;  %286 = vtanh.f32 %v122_v30  ;;  %v152_v38 = vmul.f32 %v151_v36, %v414_v0  ;;  %v154_v39 = vstv %s457_s28  ;;  %s500_s14 = sld [smem:[#allocation8 + $0x7]]  ;;  %s504_s15 = sld [smem:[#allocation6 + $0xd]] }
  0x38   :  { %v144_v40 = vadd.f32 %v143_v32, %v141_v35  ;;  %v162_v41 = vstv %s461_s29  ;;  %v165_v42 = vstv %s463_s30  ;;  %v113_v44 = vstv %s453_s27  ;;  %s508_s16 = sld [smem:[#allocation8 + $0x8]]  ;;  %s518_s4 = sld [smem:[#allocation8 + $0x9]] }
  0x39   :  { %288 = vtanh.f32 %v133_v34  ;;  %v155_v45 = vadd.f32 %v154_v39, %v152_v38  ;;  %v163_v46 = vmul.f32 %v162_v41, %v414_v0  ;;  %v173_v47 = vstv %s468_s6  ;;  %s521_s19 = sld [smem:[#allocation8 + $0xa]]  ;;  %s527_s3 = sld [smem:[#allocation8 + $0xb]] }
  0x3a   :  { %290 = vtanh.f32 %v144_v40  ;;  %v174_v49 = vmul.f32 %v173_v47, %v414_v0  ;;  %v176_v50 = vstv %s475_s8  ;;  %v184_v53 = vstv %s479_s9  ;;  %s266_s20 = sld [smem:[#allocation8 + $0xc]]  ;;  %s269_s21 = sld [smem:[#allocation8 + $0xd]] }
  0x3b   :  { %v277_v43 = vpop.eup %276  ;;  %292 = vtanh.f32 %v155_v45  ;;  %v166_v52 = vadd.f32 %v165_v42, %v163_v46  ;;  %v187_v54 = vstv %s481_s2  ;;  %v124_v57 = vstv %s471_s7  ;;  %s371_s22 = smov [#allocation9]  }
  0x3c   :  { %v70_v48 = vmul.f32 %v277_v43, %v69_v23  ;;  %v279_v51 = vpop.eup %278  ;;  %v177_v58 = vadd.f32 %v176_v50, %v174_v49  ;;  %v185_v59 = vmul.f32 %v184_v53, %v414_v0  ;;  %v195_v62 = vstv %s486_s10  ;;  %s223_s23 = sshll.u32 %s371_s22, 4  ;;  %s224_s23 = int_to_ptr.vmem [resolvable:$true] %s223_s23 }
  0x3d   :  { %v281_v55 = vpop.eup %280  ;;  %v81_v60 = vmul.f32 %v279_v51, %v80_v27  ;;  %294 = vtanh.f32 %v166_v52  ;;  %v196_v2 = vmul.f32 %v195_v62, %v414_v0  ;;  %v198_v3 = vstv %s493_s12  ;;  %s340_s24 = scalar_lea.vmem %s224_s23, 128  ;;  %p345_p2 = scmp.lt.s32.totalorder %s224_s23, %s224_s23 }
  0x3e   :  { %v71_v56 = vadd.f32 %v70_v48, %v60_v17  ;;  %v92_v61 = vmul.f32 %v281_v55, %v91_v33  ;;  %v283_v63 = vpop.eup %282  ;;  %296 = vtanh.f32 %v177_v58  ;;  %v188_v1 = vadd.f32 %v187_v54, %v185_v59  ;;  %p341_p1 = scmp.ne.s32.totalorder %s224_s23, %s340_s24  ;;  %p346_p3 = scmp.lt.s32.totalorder %s340_s24, %s340_s24 }
  0x3f   :  { %v285_v4 = vpop.eup %284  ;;  %v103_v6 = vmul.f32 %v283_v63, %v102_v37  ;;  %v135_v7 = vstv %s489_s11  ;;  %v206_v8 = vstv %s497_s13  ;;  %v199_v10 = vadd.f32 %v198_v3, %v196_v2 }
  0x40   :  { %v93_v5 = vadd.f32 %v92_v61, %v71_v56  ;;  %v114_v9 = vmul.f32 %v285_v4, %v113_v44  ;;  %298 = vtanh.f32 %v188_v1  ;;  %v207_v11 = vmul.f32 %v206_v8, %v414_v0  ;;  %p347_p4 = por %p346_p3, %p345_p2 }
  0x41   :  { %v287_v12 = vpop.eup %286  ;;  %v104_v13 = vadd.f32 %v103_v6, %v81_v60  ;;  %v146_v14 = vstv %s500_s14  ;;  %v209_v15 = vstv %s504_s15  ;;  %300 = vtanh.f32 %v199_v10 }
  0x42   :  { %v115_v17 = vadd.f32 %v114_v9, %v93_v5  ;;  %v125_v18 = vmul.f32 %v287_v12, %v124_v57  ;;  %v210_v19 = vadd.f32 %v209_v15, %v207_v11  ;;  %v157_v21 = vstv %s508_s16  ;;  %p348_p5 = pnand %p347_p4, %p341_p1 }
  0x43   :  { %v289_v16 = vpop.eup %288  ;;  %v168_v26 = vstv %s518_s4  ;;  %v179_v28 = vstv %s521_s19  ;;  %v190_v34 = vstv %s527_s3  ;;  %v201_v38 = vstv %s266_s20 }
  0x44   :  { %v136_v20 = vmul.f32 %v289_v16, %v135_v7  ;;  %v291_v22 = vpop.eup %290  ;;  %v126_v23 = vadd.f32 %v125_v18, %v104_v13  ;;  %302 = vtanh.f32 %v210_v19  ;;  %v212_v42 = vstv %s269_s21 }
  0x45   :  { %v293_v0 = vpop.eup %292  ;;  %v147_v25 = vmul.f32 %v291_v22, %v146_v14 }
  0x46   :  { %v137_v24 = vadd.f32 %v136_v20, %v115_v17  ;;  %v158_v27 = vmul.f32 %v293_v0, %v157_v21 }
  0x47   :  { %v295_v29 = vpop.eup %294  ;;  %v148_v30 = vadd.f32 %v147_v25, %v126_v23 }
  0x48   :  { %v297_v31 = vpop.eup %296  ;;  %v159_v32 = vadd.f32 %v158_v27, %v137_v24  ;;  %v169_v33 = vmul.f32 %v295_v29, %v168_v26 }
  0x49   :  { %v180_v35 = vmul.f32 %v297_v31, %v179_v28 }
  0x4a   :  { %v299_v36 = vpop.eup %298  ;;  %v170_v37 = vadd.f32 %v169_v33, %v148_v30 }
  0x4b   :  { %v181_v39 = vadd.f32 %v180_v35, %v159_v32  ;;  %v191_v40 = vmul.f32 %v299_v36, %v190_v34  ;;  %v301_v41 = vpop.eup %300 }
  0x4c   :  { %v202_v44 = vmul.f32 %v301_v41, %v201_v38 }
  0x4d   :  { %v192_v43 = vadd.f32 %v191_v40, %v170_v37 }
  0x4e   :  { %v303_v45 = vpop.eup %302  ;;  %v203_v46 = vadd.f32 %v202_v44, %v181_v39 }
  0x4f   :  { %v213_v47 = vmul.f32 %v303_v45, %v212_v42 }
  0x51   :  { %v214_v48 = vadd.f32 %v213_v47, %v192_v43 }
  0x53   :  { %v215_v49 = vadd.f32 %v214_v48, %v203_v46 }
  0x55   :  { %216 = vst [vmem:[#allocation9] sm:$0xff] %v215_v49 }
  0x56   :  { %351 = shalt.err (!%p348_p5)
}
  0x57   :  { %s352_s1 = scalar_lea.hbm %s553_s5, 128 }
  0x58   :  { %p353_p6 = scmp.ne.s32.totalorder %s553_s5, %s352_s1  ;;  %p356_p7 = scmp.lt.u32.totalorder %s352_s1, %s553_s5 }
  0x5a   :  { %p358_p8 = pnand %p356_p7, %p353_p6 }
  0x5c   :  { %361 = shalt.err (!%p358_p8)
}
  0x5d   :  { %226 = dma.vmem_to_hbm [thread:$0]  %s224_s23, 128, %s553_s5, [#allocation4]  }
  0x5e   :  { %366 = dma.done.wait [#allocation4], 128  }
  0x5f   :  { %367 = vsyncadd [#allocation4], 4294967168 }
  0x60   :  { %230 = vsyncpa [#allocation4], 1 }
  0x61   :  { %231 = vsyncpa [#allocation5], 1 }
  0x62   :  { %232 = vsyncpa [#allocation7], 1 }

</bundles_post_ra>
